<compile_context>
chip_gen: v7x
topology: tpu7x:2x2x1
jax: 0.10.0
libtpu: 0.0.40
codegen_flags: <defaults>
</compile_context>

<pallas_src>
import math
from functools import partial

import jax
import jax.numpy as jnp
from jax.experimental import pallas as pl
from jax.experimental.pallas import tpu as pltpu

_MXU_DTYPE = jnp.bfloat16      # matmul operand dtype (f32 accumulation)
_ACT_DTYPE = jnp.bfloat16      # inter-kernel activation dtype in HBM

_VMEM_LIMIT_CACHE = None


def _vmem_limit_bytes():
    """Generation-aware scoped-VMEM limit (~3/4 of physical capacity)."""
    global _VMEM_LIMIT_CACHE
    if _VMEM_LIMIT_CACHE is None:
        cap = None
        try:
            cap = getattr(pltpu.get_tpu_info(), "vmem_capacity_bytes", None)
        except Exception:
            cap = None
        if cap:
            lim = int(cap) * 3 // 4
            lim = max(32 * 1024 * 1024, min(lim, 100 * 1024 * 1024))
        else:
            lim = 48 * 1024 * 1024
        _VMEM_LIMIT_CACHE = lim
    return _VMEM_LIMIT_CACHE


def _elu(x):
    # ELU(alpha=1): x if x > 0 else exp(x) - 1 (computed in f32)
    return jnp.where(x > 0, x, jnp.exp(jnp.minimum(x, 0.0)) - 1.0)


def _dot(a, b):
    return jnp.dot(a.astype(_MXU_DTYPE), b.astype(_MXU_DTYPE),
                   preferred_element_type=jnp.float32)


def _const_spec(shape):
    nd = len(shape)
    return pl.BlockSpec(shape, lambda i, nd=nd: (0,) * nd)


def _choose_tm(m):
    """Largest multiple-of-8 tile that still yields >=2 grid steps (v7x TCs)."""
    if m <= 8:
        return m
    half = (m + 1) // 2
    tm = min(4096, ((half + 7) // 8) * 8)
    return min(tm, m)


# ------------------------- fused 1x1 (pointwise) kernel ----------------------

def _pointwise_kernel(*refs, nin):
    xs = refs[:nin]
    ws = refs[nin:2 * nin]
    b_ref = refs[2 * nin]
    o_ref = refs[2 * nin + 1]
    acc = _dot(xs[0][...], ws[0][...]) + b_ref[...]
    for x_ref, w_ref in zip(xs[1:], ws[1:]):
        acc = acc + _dot(x_ref[...], w_ref[...])
    o_ref[...] = acc.astype(o_ref.dtype)


def fused_pointwise(inputs, weights, bias, out_dtype=_ACT_DTYPE):
    """y = sum_i inputs[i] @ weights[i] + bias, tiled over M (>=2 grid steps)."""
    m = inputs[0].shape[0]
    cout = weights[0].shape[-1]
    tm = _choose_tm(m)
    in_specs, args = [], []
    for x in inputs:
        in_specs.append(pl.BlockSpec((tm, x.shape[1]), lambda i: (i, 0)))
        args.append(x.astype(_ACT_DTYPE))
    for w in weights:                       # full weight stays VMEM-resident
        in_specs.append(_const_spec(w.shape))
        args.append(w.astype(_MXU_DTYPE))
    in_specs.append(_const_spec(bias.shape))
    args.append(bias)
    return pl.pallas_call(
        partial(_pointwise_kernel, nin=len(inputs)),
        out_shape=jax.ShapeDtypeStruct((m, cout), out_dtype),
        grid=(pl.cdiv(m, tm),),
        in_specs=in_specs,
        out_specs=pl.BlockSpec((tm, cout), lambda i: (i, 0)),
        compiler_params=pltpu.CompilerParams(
            dimension_semantics=("parallel",),
            vmem_limit_bytes=_vmem_limit_bytes()),
    )(*args)


# --------------------- in-kernel 3x3 conv helpers -----------------------------

def _zero_halo(xpad_ref, hh, ww):
    """Zero the 1-pixel halo of the padded VMEM scratch (every grid step)."""
    cin = xpad_ref.shape[-1]
    dt = xpad_ref.dtype
    zrow = jnp.zeros((1, ww + 2, cin), dt)
    xpad_ref[0:1, :, :] = zrow
    xpad_ref[hh + 1:hh + 2, :, :] = zrow
    zcol = jnp.zeros((hh + 2, 1, cin), dt)
    xpad_ref[:, 0:1, :] = zcol
    xpad_ref[:, ww + 1:ww + 2, :] = zcol


def _place_branches(xpad_ref, branch_refs, hh, ww):
    """Write each (1,H,W,Cb) branch into its channel slice of the padded scratch.

    This materializes the channel concat only in VMEM (never in HBM)."""
    coff = 0
    for xr in branch_refs:
        cb = xr.shape[-1]
        xpad_ref[1:hh + 1, 1:ww + 1, coff:coff + cb] = xr[0].astype(xpad_ref.dtype)
        coff += cb


def _conv3x3_accum(xpad_ref, slab_ref, w3_ref, hh, ww):
    """3x3 'same' conv over the padded scratch as 3 per-dy matmuls (K = 3*Cin).

    w3_ref has shape (3, 3*Cin, Cout) (reshaped outside the kernel), matching
    the [dx, c] column layout of the slab scratch."""
    cin = xpad_ref.shape[-1]
    hw = hh * ww
    acc = None
    for dy in range(3):
        for dx in range(3):
            patch = xpad_ref[dy:dy + hh, dx:dx + ww, :].reshape(hw, cin)
            slab_ref[:, dx * cin:(dx + 1) * cin] = patch
        part = _dot(slab_ref[...], w3_ref[dy])
        acc = part if acc is None else acc + part
    return acc


# -------- fused [1x1 prologue] + ConcatModule + CA + [1x1 epilogue(s)] -------

def _cmca_kernel(*refs, nb, has_pro, epi_stages, epi_res_idx):
    i = 0
    branch_refs = refs[i:i + nb]; i += nb
    if has_pro:
        wp_refs = refs[i:i + nb]; i += nb
        bp_ref = refs[i]; i += 1
    (w3_ref, b3_ref, w2_ref, b2_ref, wc3_ref, bc3_ref,
     wca1_ref, bca1_ref, wca2_ref, bca2_ref) = refs[i:i + 10]
    i += 10
    if epi_stages >= 1:
        wea_ref, web_ref, be_ref = refs[i:i + 3]; i += 3
    if epi_stages >= 2:
        wn_ref, bn_ref = refs[i:i + 2]; i += 2
    o_ref = refs[i]; i += 1
    if has_pro:
        oid_ref = refs[i]; i += 1
    xpad_ref, slab_ref = refs[i], refs[i + 1]

    _, hh, ww, fea = o_ref.shape
    hw = hh * ww

    _zero_halo(xpad_ref, hh, ww)
    if has_pro:
        # Pointwise prologue (ResBlock.conv1) over the virtual concat of the
        # input branches; result both feeds the 3x3 and is a second output.
        acc = _dot(branch_refs[0][0].reshape(hw, branch_refs[0].shape[-1]),
                   wp_refs[0][...])
        for xr, wr in zip(branch_refs[1:], wp_refs[1:]):
            acc = acc + _dot(xr[0].reshape(hw, xr.shape[-1]), wr[...])
        p = acc + bp_ref[...]                                    # (hw, fea) f32
        oid_ref[...] = p.reshape(1, hh, ww, fea).astype(oid_ref.dtype)
        xpad_ref[1:hh + 1, 1:ww + 1, :] = p.reshape(hh, ww, fea).astype(xpad_ref.dtype)
    else:
        _place_branches(xpad_ref, branch_refs, hh, ww)

    # ConcatModule: 3x3 -> ELU -> 1x1 -> ELU -> 1x1 (all in VMEM, bf16 operands)
    h = _elu(_conv3x3_accum(xpad_ref, slab_ref, w3_ref, hh, ww) + b3_ref[...])
    h = _elu(_dot(h, w2_ref[...]) + b2_ref[...])
    h = _dot(h, wc3_ref[...]) + bc3_ref[...]                     # (hw, fea) f32

    # ChannelAttention: global avg-pool + squeeze/excite + sigmoid gate.
    pooled = jnp.mean(h, axis=0, keepdims=True)                  # (1, fea) f32
    t = _elu(_dot(pooled, wca1_ref[...]) + bca1_ref[...])
    s = jax.nn.sigmoid(_dot(t, wca2_ref[...]) + bca2_ref[...])   # (1, fea)
    out = h * s

    if epi_stages >= 1:
        # ResBlock.conv2 over cat([cb_out]*3) folded into two weight slabs
        # (bit-identical), fused with the trailing residual add of ident_r.
        r = branch_refs[epi_res_idx][0].reshape(hw, fea)         # bf16 ident_r
        out = (_dot(out, wea_ref[...]) + _dot(r, web_ref[...]) +
               be_ref[...] + r.astype(jnp.float32))
    if epi_stages >= 2:
        # Following HFE2 1x1 conv (conv1 / conv2) fused as a second epilogue.
        out = _dot(out, wn_ref[...]) + bn_ref[...]

    o_ref[...] = out.reshape(1, hh, ww, fea).astype(o_ref.dtype)


def cmca_block(branches, cm, ca, prologue=None, epilogue=None, epi_res_idx=0):
    n, hh, ww, _ = branches[0].shape
    fea = cm["conv1"]["w"].shape[-1]
    dt = _ACT_DTYPE
    cin3 = fea if prologue is not None else sum(b.shape[-1] for b in branches)
    w3 = cm["conv1"]["w"].reshape(3, 3 * cin3, fea).astype(_MXU_DTYPE)

    in_specs, args = [], []
    for b in branches:
        in_specs.append(pl.BlockSpec((1, hh, ww, b.shape[-1]),
                                     lambda i: (i, 0, 0, 0)))
        args.append(b)

    def addc(a):
        in_specs.append(_const_spec(a.shape))
        args.append(a)

    if prologue is not None:
        for wsl in prologue["ws"]:
            addc(wsl.astype(_MXU_DTYPE))
        addc(prologue["b"])
    addc(w3); addc(cm["conv1"]["b"])
    addc(cm["conv2"]["w"].astype(_MXU_DTYPE)); addc(cm["conv2"]["b"])
    addc(cm["conv3"]["w"].astype(_MXU_DTYPE)); addc(cm["conv3"]["b"])
    addc(ca["conv1"]["w"].astype(_MXU_DTYPE)); addc(ca["conv1"]["b"])
    addc(ca["conv2"]["w"].astype(_MXU_DTYPE)); addc(ca["conv2"]["b"])

    epi_stages = 0
    if epilogue is not None:
        epi_stages = 1
        addc(epilogue["wa"].astype(_MXU_DTYPE))
        addc(epilogue["wb"].astype(_MXU_DTYPE))
        addc(epilogue["b"])
        if "w2" in epilogue:
            epi_stages = 2
            addc(epilogue["w2"].astype(_MXU_DTYPE))
            addc(epilogue["b2"])

    out_spec = pl.BlockSpec((1, hh, ww, fea), lambda i: (i, 0, 0, 0))
    out_sd = jax.ShapeDtypeStruct((n, hh, ww, fea), dt)
    if prologue is not None:
        out_shape = (out_sd, out_sd)
        out_specs = (out_spec, out_spec)
    else:
        out_shape = out_sd
        out_specs = out_spec

    return pl.pallas_call(
        partial(_cmca_kernel, nb=len(branches), has_pro=prologue is not None,
                epi_stages=epi_stages, epi_res_idx=epi_res_idx),
        out_shape=out_shape,
        grid=(n,),
        in_specs=in_specs,
        out_specs=out_specs,
        # f32 scratches: all sub-slice halo/slab stores stay on the plain
        # 32-bit masked-store path (matmul operands are cast to bf16 anyway).
        scratch_shapes=[pltpu.VMEM((hh + 2, ww + 2, cin3), jnp.float32),
                        pltpu.VMEM((hh * ww, 3 * cin3), jnp.float32)],
        compiler_params=pltpu.CompilerParams(
            dimension_semantics=("parallel",),
            vmem_limit_bytes=_vmem_limit_bytes()),
    )(*args)


# ----------------- fused 3x3 conv (+ ELU / residual) per image ----------------

def _conv3x3_kernel(*refs, nb, act, res_idx):
    branch_refs = refs[:nb]
    w3_ref, b_ref, o_ref, xpad_ref, slab_ref = refs[nb:nb + 5]
    _, hh, ww, cout = o_ref.shape
    hw = hh * ww
    _zero_halo(xpad_ref, hh, ww)
    _place_branches(xpad_ref, branch_refs, hh, ww)
    acc = _conv3x3_accum(xpad_ref, slab_ref, w3_ref, hh, ww) + b_ref[...]
    if act == "elu":
        acc = _elu(acc)
    if res_idx is not None:
        acc = acc + branch_refs[res_idx][0].reshape(hw, cout).astype(jnp.float32)
    o_ref[...] = acc.reshape(1, hh, ww, cout).astype(o_ref.dtype)


def conv3x3_fused(branches, conv_p, act=None, res_idx=None, out_dtype=_ACT_DTYPE):
    n, hh, ww, _ = branches[0].shape
    cin3 = sum(b.shape[-1] for b in branches)
    cout = conv_p["w"].shape[-1]
    w3 = conv_p["w"].reshape(3, 3 * cin3, cout).astype(_MXU_DTYPE)
    in_specs, args = [], []
    for b in branches:
        in_specs.append(pl.BlockSpec((1, hh, ww, b.shape[-1]),
                                     lambda i: (i, 0, 0, 0)))
        args.append(b)
    in_specs.append(_const_spec(w3.shape)); args.append(w3)
    in_specs.append(_const_spec(conv_p["b"].shape)); args.append(conv_p["b"])
    return pl.pallas_call(
        partial(_conv3x3_kernel, nb=len(branches), act=act, res_idx=res_idx),
        out_shape=jax.ShapeDtypeStruct((n, hh, ww, cout), out_dtype),
        grid=(n,),
        in_specs=in_specs,
        out_specs=pl.BlockSpec((1, hh, ww, cout), lambda i: (i, 0, 0, 0)),
        scratch_shapes=[pltpu.VMEM((hh + 2, ww + 2, cin3), jnp.float32),
                        pltpu.VMEM((hh * ww, 3 * cin3), jnp.float32)],
        compiler_params=pltpu.CompilerParams(
            dimension_semantics=("parallel",),
            vmem_limit_bytes=_vmem_limit_bytes()),
    )(*args)


# ------------------------------ parameter init --------------------------------

def _conv_params(key, cin, cout, k):
    kw, kb = jax.random.split(key)
    fan_in = cin * k * k
    bound = 1.0 / math.sqrt(fan_in)
    shape = (cin, cout) if k == 1 else (k, k, cin, cout)
    w = jax.random.uniform(kw, shape, jnp.float32, -bound, bound)
    b = jax.random.uniform(kb, (1, cout), jnp.float32, -bound, bound)
    return {"w": w, "b": b}


def _concat_module_params(key, in_fea, out_fea):
    k1, k2, k3 = jax.random.split(key, 3)
    return {"conv1": _conv_params(k1, in_fea, out_fea, 3),
            "conv2": _conv_params(k2, out_fea, out_fea, 1),
            "conv3": _conv_params(k3, out_fea, out_fea, 1)}


def _ca_params(key, fea):
    k1, k2 = jax.random.split(key)
    return {"conv1": _conv_params(k1, fea, fea // 4, 1),
            "conv2": _conv_params(k2, fea // 4, fea, 1)}


def _concat_block_params(key, fea):
    ks = jax.random.split(key, 6)
    return {"cm1": _concat_module_params(ks[0], fea, fea),
            "cm2": _concat_module_params(ks[1], 2 * fea, fea),
            "cm3": _concat_module_params(ks[2], 2 * fea, fea),
            "ca1": _ca_params(ks[3], fea),
            "ca2": _ca_params(ks[4], fea),
            "ca3": _ca_params(ks[5], fea)}


def _res_block_params(key, in_fea, out_fea):
    # The reference builds concatBlock2/3 but its forward only uses concatBlock1.
    ks = jax.random.split(key, 3)
    return {"conv1": _conv_params(ks[0], in_fea, out_fea, 1),
            "conv2": _conv_params(ks[1], 6 * out_fea, out_fea, 1),
            "cb1": _concat_block_params(ks[2], out_fea)}


def hfe2_params(key, in_fea, out_fea):
    ks = jax.random.split(key, 7)
    return {"conv": _conv_params(ks[0], in_fea, out_fea, 1),
            "res1": _res_block_params(ks[1], in_fea, out_fea // 2),
            "res2": _res_block_params(ks[2], 3 * in_fea // 2, out_fea // 2),
            "conv1": _conv_params(ks[3], out_fea // 2, out_fea // 2, 1),
            "conv2": _conv_params(ks[4], out_fea // 2, out_fea // 2, 1),
            "conv3": _conv_params(ks[5], 3 * out_fea // 2, out_fea, 3),
            "upsample_conv": _conv_params(ks[6], out_fea, 4 * out_fea, 3)}


# --------------------------------- forward ------------------------------------

def res_block(branches, p, next_conv=None):
    """ResBlock over the (never-materialized) channel concat of `branches`.

    ResBlock.conv1 runs as a prologue of the first ConcatModule+CA kernel;
    conv2 + residual (and the optional following HFE2 1x1) run as epilogues of
    the last one.  concatBlock1 is applied three times to the same input with
    shared weights in the reference, so its body is computed once and the
    6*fea->fea conv2 is folded into summed weight slabs (identical math)."""
    fea = p["conv1"]["w"].shape[-1]
    cb = p["cb1"]
    # Split conv1's Cin rows per input branch (virtual concat).
    w1, splits, off = p["conv1"]["w"], [], 0
    for b in branches:
        c = b.shape[-1]
        splits.append(w1[off:off + c, :])
        off += c
    a1, identr = cmca_block(branches, cb["cm1"], cb["ca1"],
                            prologue={"ws": splits, "b": p["conv1"]["b"]})
    a2 = cmca_block([a1, identr], cb["cm2"], cb["ca2"])
    w2 = p["conv2"]["w"]                                            # (6*fea, fea)
    wsum = w2[0:2 * fea] + w2[2 * fea:4 * fea] + w2[4 * fea:6 * fea]
    epi = {"wa": wsum[:fea], "wb": wsum[fea:], "b": p["conv2"]["b"]}
    if next_conv is not None:
        epi["w2"] = next_conv["w"]
        epi["b2"] = next_conv["b"]
    return cmca_block([a2, identr], cb["cm3"], cb["ca3"],
                      epilogue=epi, epi_res_idx=1)


def pixel_shuffle_nhwc(x, r):
    # torch.nn.PixelShuffle channel ordering (c, ry, rx); pure data movement.
    n, h, w, c_full = x.shape
    c = c_full // (r * r)
    x = x.reshape(n, h, w, c, r, r)
    x = jnp.transpose(x, (0, 1, 4, 2, 5, 3))
    return x.reshape(n, h * r, w * r, c)


def hfe2_forward(x_nhwc, p, scale):
    n, hh, ww, cin = x_nhwc.shape
    m = n * hh * ww
    out_fea = p["conv"]["w"].shape[-1]
    x_bf = x_nhwc.astype(_ACT_DTYPE)
    ident = fused_pointwise([x_bf.reshape(m, cin)],
                            [p["conv"]["w"]], p["conv"]["b"])       # (M, out) bf16
    ident = ident.reshape(n, hh, ww, out_fea)
    # res1 + hfe2.conv1 fused into res1's last kernel.
    t = res_block([ident], p["res1"], next_conv=p["conv1"])         # (N,H,W,out//2)
    # res2 over virtual cat([t, ident]) + hfe2.conv2 fused into its last kernel.
    u = res_block([t, ident], p["res2"], next_conv=p["conv2"])      # (N,H,W,out//2)
    # conv3 over cat([u, ident]) fused with the trailing residual add of ident.
    y = conv3x3_fused([u, ident], p["conv3"], act=None, res_idx=1,
                      out_dtype=_ACT_DTYPE if scale == 4 else jnp.float32)
    if scale == 4:  # mirrors `if self.scale is 4` in the reference
        y = conv3x3_fused([y], p["upsample_conv"], act="elu",
                          out_dtype=jnp.float32)
        y = pixel_shuffle_nhwc(y, 2)
    return y


# ----------------------------------- main --------------------------------------

if __name__ == "__main__":
    key = jax.random.PRNGKey(0)
    kx, kp = jax.random.split(key)

    # HFE2's forward only typechecks when in_fea == out_fea.
    N, H, W = 2, 8, 8
    in_fea = out_fea = 32
    scale = 2  # pixel-shuffle branch only taken for scale == 4

    x_nchw = jax.random.normal(kx, (N, in_fea, H, W), jnp.float32)
    x_nhwc = jnp.transpose(x_nchw, (0, 2, 3, 1))

    params = hfe2_params(kp, in_fea, out_fea)
    y = hfe2_forward(x_nhwc, params, scale)
    y = jax.block_until_ready(y)

    assert y.shape == (N, H, W, out_fea), y.shape
    assert jnp.all(jnp.isfinite(y))
    print("KERNEL_OK")
</pallas_src>

<mosaic_0001>
module attributes {stable_mosaic.version = 11 : i64} {
  func.func @_pointwise_kernel(%arg0: i32, %arg1: memref<64x32xbf16, #tpu.memory_space<vmem>>, %arg2: memref<32x32xbf16, #tpu.memory_space<vmem>>, %arg3: memref<1x32xf32, #tpu.memory_space<vmem>>, %arg4: memref<64x32xbf16, #tpu.memory_space<vmem>>) attributes {dimension_semantics = [#tpu.dimension_semantics<parallel>], iteration_bounds = array<i64: 2>, scalar_prefetch = 0 : i64, scratch_operands = 0 : i64, tpu.core_type = #tpu.core_type<tc>, window_params = [{transform_indices = @transform_0, window_bounds = array<i64: 64, 32>}, {pipeline_mode = #tpu.pipeline_mode<synchronous>, transform_indices = @transform_1, window_bounds = array<i64: 32, 32>}, {pipeline_mode = #tpu.pipeline_mode<synchronous>, transform_indices = @transform_2, window_bounds = array<i64: 1, 32>}, {transform_indices = @transform_3, window_bounds = array<i64: 64, 32>}]} {
    %c0 = arith.constant 0 : index
    %c0_0 = arith.constant 0 : index
    %0 = vector.load %arg1[%c0, %c0_0] : memref<64x32xbf16, #tpu.memory_space<vmem>>, vector<64x32xbf16>
    %c0_1 = arith.constant 0 : index
    %c0_2 = arith.constant 0 : index
    %1 = vector.load %arg2[%c0_1, %c0_2] : memref<32x32xbf16, #tpu.memory_space<vmem>>, vector<32x32xbf16>
    %cst = arith.constant dense<0.000000e+00> : vector<64x32xf32>
    %2 = tpu.matmul %0, %1, %cst {dimension_numbers = #tpu.dot_dimension_numbers<[1], [0], [0], [1], [0, 0, 1, 1], [], []>} : vector<64x32xbf16>, vector<32x32xbf16>, vector<64x32xf32> -> vector<64x32xf32>
    %c0_3 = arith.constant 0 : index
    %c0_4 = arith.constant 0 : index
    %3 = vector.load %arg3[%c0_3, %c0_4] : memref<1x32xf32, #tpu.memory_space<vmem>>, vector<1x32xf32>
    %4 = vector.broadcast %3 : vector<1x32xf32> to vector<64x32xf32>
    %5 = arith.addf %2, %4 : vector<64x32xf32>
    %6 = arith.truncf %5 : vector<64x32xf32> to vector<64x32xbf16>
    %c0_5 = arith.constant 0 : index
    %c0_6 = arith.constant 0 : index
    %7 = vector.load %arg4[%c0_5, %c0_6] : memref<64x32xbf16, #tpu.memory_space<vmem>>, vector<64x32xbf16>
    tpu.vector_store %arg4[%c0_5, %c0_6], %6 {strides = array<i32>} : memref<64x32xbf16, #tpu.memory_space<vmem>>, vector<64x32xbf16>,
    return
  }
  func.func @transform_0(%arg0: i32) -> (i32, i32) {
    %c0_i32 = arith.constant 0 : i32
    %c0_i32_0 = arith.constant 0 : i32
    return %arg0, %c0_i32 : i32, i32
  }
  func.func @transform_1(%arg0: i32) -> (i32, i32) {
    %c0_i32 = arith.constant 0 : i32
    %c0_i32_0 = arith.constant 0 : i32
    %c0_i32_1 = arith.constant 0 : i32
    return %c0_i32, %c0_i32_0 : i32, i32
  }
  func.func @transform_2(%arg0: i32) -> (i32, i32) {
    %c0_i32 = arith.constant 0 : i32
    %c0_i32_0 = arith.constant 0 : i32
    %c0_i32_1 = arith.constant 0 : i32
    return %c0_i32, %c0_i32_0 : i32, i32
  }
  func.func @transform_3(%arg0: i32) -> (i32, i32) {
    %c0_i32 = arith.constant 0 : i32
    %c0_i32_0 = arith.constant 0 : i32
    return %arg0, %c0_i32 : i32, i32
  }
}

</mosaic_0001>

<bundles_post_ra>
// kernel: tpu_custom_call.1
= control target key start
LH: loop header
LB: loop body
LE: loop exit
PB: predicated region body
PF: predicated region fallthrough
CT: control target
= control target key end

     0   :  { %s503_s12 = smov 0   ;;  %s537_s0 = inlined_call_operand.vmem [shape: bf16[128,32], index: 0, kind: input, shape index: {}]   ;;  %s538_s1 = inlined_call_operand.vmem [shape: bf16[32,32], index: 1, kind: input, shape index: {}]   ;;  %s539_s2 = inlined_call_operand.vmem [shape: f32[1,32], index: 2, kind: input, shape index: {}]   ;;  %s540_s3 = inlined_call_operand.vmem [shape: bf16[128,32], index: 3, kind: output, shape index: {}]  }
   0x1 LB: > { %s401_s13 = sadd.s32 4294967295, %s481_s12   ;;  %p405_p0 = scmp.ge.s32.totalorder %s481_s12, 1  ;;  %s481_s12 = sphi %s503_s12, %s13_s12  }
   0x2   : > { %p138_p1 = scmp.lt.s32.totalorder %s481_s12, 3 }
   0x4   : > { %p139_p2 = pnand %p405_p0, %p138_p1 }
   0x5   : > { %v469_v0 = vld [vmem:[%s538_s1] sm:$0xff] (!%p139_p2)   ;;  %s406_s16 = sshll.u32 (!%p139_p2), %s401_s13, 3  ;;  %v470_v1 = vld [vmem:[%s538_s1 + $0x8] sm:$0xff] (!%p139_p2)   ;;  %vm226_vm0 = vcmask (!%p139_p2), 261120   ;;  %vm336_vm1 = vcmask (!%p139_p2), 257024  }
   0x6   : > { %142 = sbr.rel (%p139_p2) target bundleno = 238 (0xee), region = 32  ;;  %p163_p3 = scmp.lt.s32.totalorder (!%p139_p2), %s406_s16, 15  ;;  %445 = vmatprep.subr.bf16.mxu0 (!%p139_p2), %v469_v0  ;;  %457 = vmatprep.subr.bf16.mxu1 (!%p139_p2), %v469_v0  ;;  %v410_v6 = vld [vmem:[%s539_s2] ss:$0 sm:$0xff] (!%p139_p2) }
   0x7   : > { %446 = vmatpush3.bf16.msra.mxu0 (!%p139_p2), %v469_v0  ;;  %459 = vmatpush3.bf16.msra.mxu1 (!%p139_p2), %v469_v0 }
   0x8   : > { %447 = vmatprep.subr.bf16.mxu0 (!%p139_p2), %v470_v1  ;;  %458 = vmatprep.subr.bf16.mxu1 (!%p139_p2), %v470_v1 }
   0xb   : > { %448 = vmatpush3.bf16.msra.mxu0 (!%p139_p2), %v470_v1  ;;  %460 = vmatpush3.bf16.msra.mxu1 (!%p139_p2), %v470_v1 }
   0xd   : > { %s542_s16 = smov (!%p163_p3, %s406_s16), 15 }
   0xe   : > { %s407_s19 = sshll.u32 %s542_s16, 2 }
   0xf   : > { %s166_s22 = scalar_lea.vmem %s537_s0, %s407_s19  ;;  %s172_s27 = scalar_lea.vmem %s540_s3, %s407_s19 }
  0x10   : > { %v471_v2 = vld [vmem:[%s166_s22] sm:$0xff]   ;;  %v472_v3 = vld [vmem:[%s166_s22 + $0x10] sm:$0xff]   ;;  %v473_v4 = vld [vmem:[%s166_s22 + $0x8] sm:$0xff]  }
  0x11   : > { %449 = vmatprep.mubr.msk.bf16.mxu0 %vm226_vm0, %v471_v2  ;;  %453 = vmatprep.mubr.msk.bf16.mxu1 %vm226_vm0, %v472_v3  ;;  %v474_v5 = vld [vmem:[%s166_s22 + $0x18] sm:$0xff]  }
  0x12   : > { %450 = vmatmul.mubr.msk.bf16.vlgmr.msra.gmra.mrb[0].mxu0 %vm226_vm0, %v473_v4  ;;  %454 = vmatmul.mubr.msk.bf16.vlgmr.msra.gmra.mrb[0].mxu1 %vm226_vm0, %v474_v5 }
  0xe5   : > { %v451_v7 = vpop.f32.mrb[0].mxu0  ;;  %v455_v9 = vpop.f32.mrb[0].mxu1 }
  0xe6   : > { %v282_v8 = vadd.f32 %v451_v7, %v410_v6  ;;  %v273_v10 = vpop.f32.mrb[1].mxu0  ;;  %v298_v11 = vadd.f32 %v455_v9, %v410_v6  ;;  %v289_v13 = vpop.f32.mrb[1].mxu1 }
  0xe7   : > { %v274_v12 = vadd.f32 %v410_v6, %v273_v10  ;;  %v452_v14 = vpop.f32.mrb[2].mxu0  ;;  %v290_v16 = vadd.f32 %v410_v6, %v289_v13  ;;  %v456_v18 = vpop.f32.mrb[2].mxu1 }
  0xe8   : > { %v433_v15 = vpack.c.bf16 %v282_v8, %v282_v8  ;;  %v285_v17 = vadd.f32 %v452_v14, %v410_v6  ;;  %v276_v19 = vpop.f32.mrb[3].mxu0  ;;  %v437_v20 = vpack.c.bf16 %v298_v11, %v298_v11  ;;  %v301_v22 = vadd.f32 %v456_v18, %v410_v6  ;;  %v292_v24 = vpop.f32.mrb[3].mxu1 }
  0xe9   : > { %v431_v21 = vpack.c.bf16 %v274_v12, %v274_v12  ;;  %v277_v23 = vadd.f32 %v410_v6, %v276_v19  ;;  %v435_v25 = vpack.c.bf16 %v290_v16, %v290_v16  ;;  %v293_v27 = vadd.f32 %v410_v6, %v292_v24 }
  0xea   : > { %339 = vst.msk [vmem:[%s172_s27 + $0x8] sm:$0xf] %vm336_vm1, %v433_v15  ;;  %v434_v26 = vpack.c.bf16 %v285_v17, %v285_v17  ;;  %343 = vst.msk [vmem:[%s172_s27 + $0x18] sm:$0xf] %vm336_vm1, %v437_v20  ;;  %v438_v28 = vpack.c.bf16 %v301_v22, %v301_v22 }
  0xeb   : > { %337 = vst.msk [vmem:[%s172_s27] sm:$0xf] %vm336_vm1, %v431_v21  ;;  %v432_v29 = vpack.c.bf16 %v277_v23, %v277_v23  ;;  %341 = vst.msk [vmem:[%s172_s27 + $0x10] sm:$0xf] %vm336_vm1, %v435_v25  ;;  %v436_v30 = vpack.c.bf16 %v293_v27, %v293_v27 }
  0xec   : > { %340 = vst.msk [vmem:[%s172_s27 + $0xc] sm:$0xf] %vm336_vm1, %v434_v26  ;;  %344 = vst.msk [vmem:[%s172_s27 + $0x1c] sm:$0xf] %vm336_vm1, %v438_v28 }
  0xed   : > { %338 = vst.msk [vmem:[%s172_s27 + $0x4] sm:$0xf] %vm336_vm1, %v432_v29  ;;  %342 = vst.msk [vmem:[%s172_s27 + $0x14] sm:$0xf] %vm336_vm1, %v436_v30 }
  0xee PF: > { %s13_s12 = sadd.s32 1, %s481_s12  }
  0xef   : > { %p10_p4 = scmp.ge.s32.totalorder %s13_s12, 4  }
  0xf1   :  { %12 = sbr.rel (!%p10_p4) target bundleno = 1 (0x1), region = 62 }

</bundles_post_ra>
